<compile_context>
chip_gen: v5e
topology: v5e:2x2
jax: 0.10.0
libtpu: 0.0.40
codegen_flags: <defaults>
</compile_context>

<pallas_src>
import math

import jax
import jax.numpy as jnp
from jax.experimental import pallas as pl
from jax.experimental.pallas import tpu as pltpu


_LANE = 128                          # lane width; logits dim is padded to this
_VMEM_BLOCK_BUDGET = 14 << 20        # conservative: fits v5e's 16 MiB scoped default


def _round_up(x, m):
    return ((x + m - 1) // m) * m


def _round_down(x, m):
    return (x // m) * m


def _bert_head_kernel(x_ref, w_ref, b_ref, a_ref, logits_ref, weights_ref):
    # x: (TB, HID)  w: (HID, OUT_PAD)  b: (1, OUT_PAD)  a: (TB, NH, K)
    acc = jnp.dot(x_ref[...], w_ref[...], preferred_element_type=jnp.float32)
    logits_ref[...] = (acc + b_ref[...].astype(jnp.float32)).astype(logits_ref.dtype)

    a = a_ref[...].astype(jnp.float32)                      # f32 accumulation
    nh = a.shape[1]
    weights_ref[...] = (jnp.sum(a, axis=1) * (1.0 / nh)).astype(weights_ref.dtype)


def _pick_tb(B, per_row_bytes, resident_bytes, budget_bytes, tb_cap=256):
    """Largest multiple-of-8 batch tile that fits the VMEM budget.

    For B > 8 the tile is also capped at round_up(ceil(B/2), 8) so the grid
    length stays >= 2 and dimension_semantics=("parallel",) can shard the
    batch axis across both v7x TensorCores (no-op on 1-TC v5e/v6e).
    """
    if B <= 8:
        return B
    avail = max(budget_bytes - resident_bytes, 8 * per_row_bytes)
    tb = _round_down(avail // per_row_bytes, 8)
    tb = max(8, min(tb, tb_cap))
    tb = min(tb, _round_up((B + 1) // 2, 8))   # keep grid >= 2 for v7x
    return tb


def bert_head_forward(pooled, attn_cls, w_pad, b_pad, out_dim, *, tb=None):
    """
    pooled   : (B, HID)        pooled_output from the BERT wrapper
    attn_cls : (B, NH, K)      attention_weights[-1][:, :, 0, :] (pre-sliced, contiguous)
    w_pad    : (HID, OUT_PAD)  output_layer weight, transposed + lane-padded once
    b_pad    : (1, OUT_PAD)    output_layer bias, lane-padded once
    out_dim  : Python int      true number of labels (logits sliced to this)
    returns (logits (B, out_dim), weights (B, K))
    """
    B, HID = pooled.shape
    _, NH, K = attn_cls.shape
    OUT_PAD = w_pad.shape[1]

    itm_x = pooled.dtype.itemsize
    itm_a = attn_cls.dtype.itemsize

    # Double-buffered per-batch-row VMEM cost of the pipelined blocks.
    per_row = 2 * (NH * K * itm_a + HID * itm_x + OUT_PAD * itm_x + K * itm_a)
    # Constant-index weight/bias blocks (counted with their second buffer).
    resident = 2 * (HID * OUT_PAD + OUT_PAD) * w_pad.dtype.itemsize

    if tb is None:
        tb = _pick_tb(B, per_row, resident, _VMEM_BLOCK_BUDGET)
    grid = (pl.cdiv(B, tb),)

    vmem_need = tb * per_row + resident
    vmem_limit = int(min(max(vmem_need + (2 << 20), 16 << 20), 48 << 20))

    cost = pl.CostEstimate(
        flops=2 * B * HID * OUT_PAD,
        transcendentals=0,
        bytes_accessed=(
            pooled.size * itm_x
            + attn_cls.size * itm_a
            + w_pad.size * w_pad.dtype.itemsize
            + b_pad.size * b_pad.dtype.itemsize
            + B * OUT_PAD * itm_x
            + B * K * itm_a
        ),
    )

    logits_pad, weights = pl.pallas_call(
        _bert_head_kernel,
        out_shape=(
            jax.ShapeDtypeStruct((B, OUT_PAD), pooled.dtype),
            jax.ShapeDtypeStruct((B, K), attn_cls.dtype),
        ),
        grid_spec=pltpu.PrefetchScalarGridSpec(
            num_scalar_prefetch=0,
            grid=grid,
            in_specs=[
                pl.BlockSpec((tb, HID), lambda i: (i, 0)),
                pl.BlockSpec((HID, OUT_PAD), lambda i: (0, 0)),   # VMEM-resident weight
                pl.BlockSpec((1, OUT_PAD), lambda i: (0, 0)),     # VMEM-resident bias
                pl.BlockSpec((tb, NH, K), lambda i: (i, 0, 0)),   # contiguous CLS rows
            ],
            out_specs=[
                pl.BlockSpec((tb, OUT_PAD), lambda i: (i, 0)),    # lane-dense store
                pl.BlockSpec((tb, K), lambda i: (i, 0)),
            ],
        ),
        compiler_params=pltpu.CompilerParams(
            dimension_semantics=("parallel",),
            vmem_limit_bytes=vmem_limit,
        ),
        cost_estimate=cost,
    )(pooled, w_pad, b_pad, attn_cls)

    return logits_pad[:, :out_dim], weights


if __name__ == "__main__":
    # TODO(synk): the pretrained BERT backbone (AutoModel inside BertModelWrapper)
    # is not reproducible in-script; its outputs (pooled_output, last-layer
    # attention) are synthesized deterministically below.
    B, S, HID, NH, OUT = 2, 128, 32, 4, 2

    key = jax.random.PRNGKey(0)
    k1, k2, k3 = jax.random.split(key, 3)

    # Synthetic backbone outputs.
    pooled_output = jax.random.normal(k1, (B, HID), dtype=jnp.float32)
    attn_logits = jax.random.normal(k2, (B, NH, S, S), dtype=jnp.float32)
    attention_weights_last = jax.nn.softmax(attn_logits, axis=-1)

    # output_layer params (xavier_uniform weight, zero bias).
    limit = math.sqrt(6.0 / (HID + OUT))
    w_out = jax.random.uniform(
        k3, (OUT, HID), dtype=jnp.float32, minval=-limit, maxval=limit
    )
    b_out = jnp.zeros((OUT,), dtype=jnp.float32)

    # One-time parameter prep: transpose + pad the logits dim to a full lane
    # (unmasked vst stores, 128 real MXU columns); done once, not per call.
    OUT_PAD = _round_up(OUT, _LANE)
    w_pad = jnp.zeros((HID, OUT_PAD), w_out.dtype).at[:, :OUT].set(w_out.T)
    b_pad = jnp.zeros((1, OUT_PAD), b_out.dtype).at[0, :OUT].set(b_out)

    # CLS-query rows pre-sliced once in XLA (tiny: B*NH*S, contiguous result),
    # so the kernel's per-step DMA is a single contiguous run per batch row.
    attn_cls = attention_weights_last[:, :, 0, :]
    # Optional: attn_cls = attn_cls.astype(jnp.bfloat16)  # halves the dominant DMA;
    # kept f32 here so the reference check below stays exact.

    fwd = jax.jit(lambda p, a, w, b: bert_head_forward(p, a, w, b, OUT))
    logits, weights = fwd(pooled_output, attn_cls, w_pad, b_pad)
    jax.block_until_ready((logits, weights))

    # Cross-check against a plain-JAX reference of the module's forward.
    ref_logits = pooled_output @ w_out.T + b_out
    ref_weights = attention_weights_last[:, :, 0, :].mean(axis=1)
    assert logits.shape == (B, OUT) and weights.shape == (B, S)
    assert jnp.allclose(logits, ref_logits, atol=1e-4)
    assert jnp.allclose(weights, ref_weights, atol=1e-6)

    print("KERNEL_OK")
</pallas_src>

<mosaic_0001>
module attributes {stable_mosaic.version = 11 : i64} {
  func.func @_bert_head_kernel(%arg0: i32, %arg1: memref<2x32xf32, #tpu.memory_space<vmem>>, %arg2: memref<32x128xf32, #tpu.memory_space<vmem>>, %arg3: memref<1x128xf32, #tpu.memory_space<vmem>>, %arg4: memref<2x4x128xf32, #tpu.memory_space<vmem>>, %arg5: memref<2x128xf32, #tpu.memory_space<vmem>>, %arg6: memref<2x128xf32, #tpu.memory_space<vmem>>) attributes {dimension_semantics = [#tpu.dimension_semantics<parallel>], iteration_bounds = array<i64: 1>, scalar_prefetch = 0 : i64, scratch_operands = 0 : i64, tpu.core_type = #tpu.core_type<tc>, window_params = [{transform_indices = @transform_0, window_bounds = array<i64: 2, 32>}, {pipeline_mode = #tpu.pipeline_mode<synchronous>, transform_indices = @transform_1, window_bounds = array<i64: 32, 128>}, {pipeline_mode = #tpu.pipeline_mode<synchronous>, transform_indices = @transform_2, window_bounds = array<i64: 1, 128>}, {transform_indices = @transform_3, window_bounds = array<i64: 2, 4, 128>}, {transform_indices = @transform_4, window_bounds = array<i64: 2, 128>}, {transform_indices = @transform_5, window_bounds = array<i64: 2, 128>}]} {
    %c0 = arith.constant 0 : index
    %c0_0 = arith.constant 0 : index
    %0 = vector.load %arg1[%c0, %c0_0] : memref<2x32xf32, #tpu.memory_space<vmem>>, vector<2x32xf32>
    %c0_1 = arith.constant 0 : index
    %c0_2 = arith.constant 0 : index
    %1 = vector.load %arg2[%c0_1, %c0_2] : memref<32x128xf32, #tpu.memory_space<vmem>>, vector<32x128xf32>
    %cst = arith.constant dense<0.000000e+00> : vector<2x128xf32>
    %2 = tpu.matmul %0, %1, %cst {dimension_numbers = #tpu.dot_dimension_numbers<[1], [0], [0], [1], [0, 0, 1, 1], [], []>} : vector<2x32xf32>, vector<32x128xf32>, vector<2x128xf32> -> vector<2x128xf32>
    %c0_3 = arith.constant 0 : index
    %c0_4 = arith.constant 0 : index
    %3 = vector.load %arg3[%c0_3, %c0_4] : memref<1x128xf32, #tpu.memory_space<vmem>>, vector<1x128xf32>
    %4 = vector.broadcast %3 : vector<1x128xf32> to vector<2x128xf32>
    %5 = arith.addf %2, %4 : vector<2x128xf32>
    %c0_5 = arith.constant 0 : index
    %c0_6 = arith.constant 0 : index
    %6 = vector.load %arg5[%c0_5, %c0_6] : memref<2x128xf32, #tpu.memory_space<vmem>>, vector<2x128xf32>
    tpu.vector_store %arg5[%c0_5, %c0_6], %5 {strides = array<i32>} : memref<2x128xf32, #tpu.memory_space<vmem>>, vector<2x128xf32>,
    %c0_7 = arith.constant 0 : index
    %c0_8 = arith.constant 0 : index
    %c0_9 = arith.constant 0 : index
    %7 = vector.load %arg4[%c0_7, %c0_8, %c0_9] : memref<2x4x128xf32, #tpu.memory_space<vmem>>, vector<2x4x128xf32>
    %cst_10 = arith.constant dense<0.000000e+00> : vector<2x128xf32>
    %8 = vector.multi_reduction <add>, %7, %cst_10 [1] : vector<2x4x128xf32> to vector<2x128xf32>
    %cst_11 = arith.constant 2.500000e-01 : f32
    %9 = vector.broadcast %cst_11 : f32 to vector<2x128xf32>
    %10 = arith.mulf %8, %9 : vector<2x128xf32>
    %c0_12 = arith.constant 0 : index
    %c0_13 = arith.constant 0 : index
    %11 = vector.load %arg6[%c0_12, %c0_13] : memref<2x128xf32, #tpu.memory_space<vmem>>, vector<2x128xf32>
    tpu.vector_store %arg6[%c0_12, %c0_13], %10 {strides = array<i32>} : memref<2x128xf32, #tpu.memory_space<vmem>>, vector<2x128xf32>,
    return
  }
  func.func @transform_0(%arg0: i32) -> (i32, i32) {
    %c0_i32 = arith.constant 0 : i32
    %c0_i32_0 = arith.constant 0 : i32
    return %arg0, %c0_i32 : i32, i32
  }
  func.func @transform_1(%arg0: i32) -> (i32, i32) {
    %c0_i32 = arith.constant 0 : i32
    %c0_i32_0 = arith.constant 0 : i32
    %c0_i32_1 = arith.constant 0 : i32
    return %c0_i32, %c0_i32_0 : i32, i32
  }
  func.func @transform_2(%arg0: i32) -> (i32, i32) {
    %c0_i32 = arith.constant 0 : i32
    %c0_i32_0 = arith.constant 0 : i32
    %c0_i32_1 = arith.constant 0 : i32
    return %c0_i32, %c0_i32_0 : i32, i32
  }
  func.func @transform_3(%arg0: i32) -> (i32, i32, i32) {
    %c0_i32 = arith.constant 0 : i32
    %c0_i32_0 = arith.constant 0 : i32
    %c0_i32_1 = arith.constant 0 : i32
    return %arg0, %c0_i32, %c0_i32_0 : i32, i32, i32
  }
  func.func @transform_4(%arg0: i32) -> (i32, i32) {
    %c0_i32 = arith.constant 0 : i32
    %c0_i32_0 = arith.constant 0 : i32
    return %arg0, %c0_i32 : i32, i32
  }
  func.func @transform_5(%arg0: i32) -> (i32, i32) {
    %c0_i32 = arith.constant 0 : i32
    %c0_i32_0 = arith.constant 0 : i32
    return %arg0, %c0_i32 : i32, i32
  }
}

</mosaic_0001>

<bundles_post_ra>
// kernel: _lambda_.1
= control target key start
LH: loop header
LB: loop body
LE: loop exit
PB: predicated region body
PF: predicated region fallthrough
CT: control target
= control target key end

     0   :  { %11 = vsyncpa [#allocation3], 0  ;;  %s355_s0 = inlined_call_operand.hbm [shape: f32[2,32], index: 0, kind: input, shape index: {}]   ;;  %s356_s1 = inlined_call_operand.hbm [shape: f32[32,128], index: 1, kind: input, shape index: {}]   ;;  %s357_s2 = inlined_call_operand.vmem [shape: f32[1,128], index: 2, kind: input, shape index: {}]   ;;  %s358_s3 = inlined_call_operand.hbm [shape: f32[2,4,128], index: 3, kind: input, shape index: {}]   ;;  %s359_s4 = inlined_call_operand.hbm [shape: f32[2,128], index: 4, kind: output, shape index: {0}]   ;;  %s360_s5 = inlined_call_operand.hbm [shape: f32[2,128], index: 5, kind: output, shape index: {1}]  }
   0x1   :  { %12 = vsyncpa [#allocation6], 0 }
   0x2   :  { %13 = vsyncpa [#allocation4], 0  ;;  %s30_s20 = sshll.u32 %s356_s1, 4  ;;  %s31_s20 = int_to_ptr.hbm [resolvable:$true] %s30_s20 }
   0x3   :  { %14 = vsyncpa [#allocation10], 0  ;;  %s298_s21 = smov [#allocation5]   ;;  %s20_s25 = sshll.u32 %s355_s0, 4  ;;  %s21_s25 = int_to_ptr.hbm [resolvable:$true] %s20_s25 }
   0x4   :  { %s32_s22 = sshll.u32 %s298_s21, 4  ;;  %s299_s26 = smov 128   ;;  %s33_s22 = int_to_ptr.vmem [resolvable:$true] %s32_s22 }
   0x5   :  { %s300_s27 = smov 8   ;;  %s301_s28 = smov [#allocation2]  }
   0x6   :  { %38 = dma.hbm_to_vmem [thread:$0]  %s31_s20, 512, %s33_s22, [#allocation6], %s299_s26, %s299_s26, %s300_s27  }
   0x7   :  { %s22_s29 = sshll.u32 %s301_s28, 4  ;;  %s45_s7 = sshll.u32 %s358_s3, 4  ;;  %s23_s29 = int_to_ptr.vmem [resolvable:$true] %s22_s29  ;;  %s46_s7 = int_to_ptr.hbm [resolvable:$true] %s45_s7 }
   0x8   :  { %25 = dma.hbm_to_vmem [thread:$0]  %s21_s25, 32, %s23_s29, [#allocation3]  }
   0x9   :  { %s302_s1 = smov [#allocation7]   ;;  %s303_s9 = smov 64  }
   0xa   :  { %s47_s8 = sshll.u32 %s302_s1, 4  ;;  %s304_s10 = smov 4   ;;  %s48_s8 = int_to_ptr.vmem [resolvable:$true] %s47_s8 }
   0xb   :  { %53 = dma.hbm_to_vmem [thread:$0]  %s46_s7, 128, %s48_s8, [#allocation6], %s303_s9, %s303_s9, %s304_s10  }
   0xc   :  { %290 = dma.done.wait [#allocation3], 32  }
   0xd   :  { %291 = vsyncadd [#allocation3], 4294967264 }
   0xe   :  { %292 = dma.done.wait [#allocation6], 640  }
   0xf   :  { %293 = vsyncadd [#allocation6], 4294966656  ;;  %v70_v0 = vld [vmem:[#allocation5 + $0x18] sm:$0xff]  ;;  %v69_v1 = vld [vmem:[#allocation5 + $0x10] sm:$0xff]  ;;  %vm75_vm0 = vcmask 261120   ;;  %vm102_vm1 = vcmask 1043456  }
  0x10   :  { %91 = vmatpush.msra.mxu0 %v70_v0  ;;  %v68_v2 = vld [vmem:[#allocation5 + $0x8] sm:$0xff]  ;;  %v67_v3 = vld [vmem:[#allocation5] sm:$0xff]  ;;  %v66_v4 = vld [vmem:[#allocation2] sm:$0x3]  ;;  %s305_s0 = smov [#allocation9]   ;;  %s143_s13 = sshll.u32 %s360_s5, 4  ;;  %s144_s13 = int_to_ptr.hbm [resolvable:$true] %s143_s13 }
  0x11   :  { %v100_v5 = vld [vmem:[#allocation7] sm:$0xf]  ;;  %v101_v6 = vld [vmem:[#allocation7 + $0x4] sm:$0xf]  ;;  %s141_s3 = sshll.u32 %s305_s0, 4  ;;  %vm121_vm2 = vcmask 1041409   ;;  %s142_s3 = int_to_ptr.vmem [resolvable:$true] %s141_s3 }
  0x12   :  { %92 = vmatpush.msra.mxu0 %v69_v1  ;;  %v103_v7 = vsel %vm102_vm1, %v100_v5, 0.0  ;;  %v110_v8 = vsel %vm102_vm1, %v101_v6, 0.0  ;;  %v169_v24 = vld [vmem:[%s357_s2] ss:$0 sm:$0xff]  ;;  %s306_s16 = smov [#allocation8]   ;;  %s132_s20 = sshll.u32 %s359_s4, 4  ;;  %s133_s20 = int_to_ptr.hbm [resolvable:$true] %s132_s20 }
  0x13   :  { %v104_v9 = vrot.slane %v103_v7, 4  ;;  %v111_v10 = vrot.slane %v110_v8, 4  ;;  %s130_s17 = sshll.u32 %s306_s16, 4  ;;  %s131_s17 = int_to_ptr.vmem [resolvable:$true] %s130_s17 }
  0x14   :  { %93 = vmatpush.msra.mxu0 %v68_v2 }
  0x15   :  { %v105_v11 = vadd.f32 %v104_v9, %v103_v7  ;;  %v112_v12 = vadd.f32 %v111_v10, %v110_v8 }
  0x16   :  { %94 = vmatpush.msra.mxu0 %v67_v3 }
  0x17   :  { %159 = vmatmul.msk.f32.vlgmr.msra.gmra.mxu0 %vm75_vm0, %v66_v4  ;;  %v106_v13 = vrot.slane %v105_v11, 2  ;;  %v113_v14 = vrot.slane %v112_v12, 2 }
  0x19   :  { %v107_v15 = vadd.f32 %v106_v13, %v105_v11  ;;  %v114_v16 = vadd.f32 %v113_v14, %v112_v12 }
  0x1b   :  { %v108_v17 = vrot.slane %v107_v15, 1  ;;  %v115_v18 = vrot.slane %v114_v16, 1 }
  0x1d   :  { %v109_v19 = vadd.f32 %v108_v17, %v107_v15  ;;  %v116_v20 = vadd.f32 %v115_v18, %v114_v16 }
  0x1f   :  { %v117_v21 = vmul.f32 0.25, %v109_v19  ;;  %v118_v22 = vmul.f32 0.25, %v116_v20 }
  0x21   :  { %v122_v23 = vsel %vm121_vm2, %v118_v22, %v117_v21 }
  0x22   :  { %124 = vst [vmem:[#allocation9] sm:$0x3] %v122_v23 }
  0x23   :  { %146 = dma.vmem_to_hbm [thread:$0]  %s142_s3, 32, %s144_s13, [#allocation10]  }
  0x94   :  { %v96_v25 = vpop.f32.mrf.mxu0 }
  0x95   :  { %v97_v26 = vadd.f32 %v169_v24, %v96_v25 }
  0x97   :  { %99 = vst [vmem:[#allocation8] sm:$0x3] %v97_v26 }
  0x98   :  { %135 = dma.vmem_to_hbm [thread:$0]  %s131_s17, 32, %s133_s20, [#allocation4]  }
  0x99   :  { %294 = dma.done.wait [#allocation4], 32  }
  0x9a   :  { %295 = vsyncadd [#allocation4], 4294967264 }
  0x9b   :  { %296 = dma.done.wait [#allocation10], 32  }
  0x9c   :  { %297 = vsyncadd [#allocation10], 4294967264 }
  0x9d   :  { %155 = vsyncpa [#allocation3], 1 }
  0x9e   :  { %156 = vsyncpa [#allocation6], 1 }
  0x9f   :  { %157 = vsyncpa [#allocation4], 1 }
  0xa0   :  { %158 = vsyncpa [#allocation10], 1 }

</bundles_post_ra>
